<compile_context>
chip_gen: v6e
topology: v6e:2x2x1
jax: 0.10.0
libtpu: 0.0.40
codegen_flags: <defaults>
</compile_context>

<pallas_src>
import numpy as np
import jax
import jax.numpy as jnp
from jax.experimental import pallas as pl
from jax.experimental.pallas import tpu as pltpu


def make_positional_encoding(channels: int) -> jnp.ndarray:
    """Reproduces the PyTorch __init__ buffer exactly: f32 (1, C, 8, 8)."""
    pe = np.zeros((8, 8, channels), dtype=np.float32)
    for i in range(8):
        for j in range(8):
            for k in range(0, channels, 2):
                pe[i, j, k] = np.sin(i / 10000 ** (k / channels))
                if k + 1 < channels:
                    pe[i, j, k + 1] = np.cos(j / 10000 ** (k / channels))
    pe = np.transpose(pe, (2, 0, 1))[None, ...]   # permute(2,0,1).unsqueeze(0)
    return jnp.asarray(pe, dtype=jnp.float32)


def prepare_pe(pe_nchw: jnp.ndarray) -> jnp.ndarray:
    """One-time (init-side) flatten of the pe buffer into the kernel layout.

    Hoisted out of the forward wrapper so the per-call path carries no extra
    convert/reshape ops.  pe stays f32 (it is tiny) so the add is done in f32.
    """
    _, C, H, W = pe_nchw.shape
    L = C * H * W
    pe_flat = jnp.asarray(pe_nchw, jnp.float32).reshape(L)
    if L % 128 == 0:
        return pe_flat.reshape(1, L // 128, 128)   # lane-dense rows of 128
    return pe_flat.reshape(1, L)                   # odd-C fallback


def _add_pe_kernel(x_ref, pe_ref, o_ref):
    # pe_ref is f32; add in f32 (matches the PyTorch f32 buffer), cast once.
    o_ref[...] = (x_ref[...].astype(jnp.float32) + pe_ref[...]).astype(o_ref.dtype)


def _tpu_budgets():
    """Generation-aware (target_tile_bytes, vmem_limit_bytes)."""
    vmem_cap = 64 << 20                    # conservative default if query fails
    try:
        info = pltpu.get_tpu_info()
        cap = getattr(info, "vmem_capacity_bytes", None)
        if cap:
            vmem_cap = int(cap)
    except Exception:
        pass
    if vmem_cap <= (64 << 20):             # v7x: 64 MiB VMEM per TensorCore
        return 8 << 20, 48 << 20
    return 12 << 20, 64 << 20              # v5e / v6e: 128 MiB VMEM


def _sublane_pack(itemsize: int) -> int:
    # Sub-32-bit dtypes pack along sublanes: 8 (f32), 16 (bf16), 32 (int8/fp8).
    return 8 * max(1, 4 // itemsize)


def _plan_3d(N, Lr, itemsize, target_tile_bytes, total_bytes):
    """Pick (tb, tl) block sizes for the (N, Lr, 128) lane-dense layout."""
    sub = _sublane_pack(itemsize)
    lane_row_bytes = 128 * itemsize
    rows_budget = max(1, target_tile_bytes // lane_row_bytes)
    if Lr <= rows_budget:
        tl = Lr                                     # full extent: always legal
        tb = min(N, max(1, rows_budget // Lr))
    else:
        # Very large C: put L on its own grid axis, keep tiles bounded.
        tl = max(sub, (rows_budget // sub) * sub)
        tb = 1
    # v7x megacore: a bandwidth-bound problem must yield >= 2 grid steps.
    if total_bytes >= (2 << 20) and pl.cdiv(N, tb) * pl.cdiv(Lr, tl) < 2:
        if N >= 2:
            tb = pl.cdiv(N, 2)
        elif Lr >= 2 * sub:
            tl = max(sub, ((Lr // 2) // sub) * sub)
    return tb, tl


def _plan_2d(N, L, itemsize, target_tile_bytes, total_bytes):
    """Pick tb for the odd-C (N, L) fallback layout."""
    sub = _sublane_pack(itemsize)
    row_bytes = L * itemsize
    tb = max(1, target_tile_bytes // row_bytes)
    if total_bytes >= (2 << 20):
        tb = min(tb, pl.cdiv(N, 2))                 # feed both v7x TensorCores
    if tb >= N:
        return N                                    # full extent: always legal
    tb = max(sub, (tb // sub) * sub)                # dtype-aware sublane align
    return N if tb >= N else tb


def positional_encoding_forward(x: jnp.ndarray, pe_prepared: jnp.ndarray,
                                *, min_pallas_bytes: int = 0) -> jnp.ndarray:
    """x: (N, C, 8, 8) + prepared pe -> (N, C, 8, 8)."""
    N, C, H, W = x.shape
    assert (H, W) == (8, 8), "PositionalEncoding buffer is fixed at 8x8 board"
    L = C * H * W
    itemsize = jnp.dtype(x.dtype).itemsize
    total_bytes = N * L * itemsize

    # Launch-overhead escape hatch: a standalone streaming add on a few-KiB
    # tensor is dominated by call overhead -> let XLA fuse the plain add.
    if total_bytes < min_pallas_bytes:
        pe_f32 = pe_prepared.reshape(1, C, H, W)
        return (x.astype(jnp.float32) + pe_f32).astype(x.dtype)

    target_tile_bytes, vmem_limit = _tpu_budgets()

    if pe_prepared.ndim == 3:
        # Lane-dense path: (N, Lr, 128) -> full 128-lane rows for any batch.
        Lr = L // 128
        assert pe_prepared.shape == (1, Lr, 128)
        tb, tl = _plan_3d(N, Lr, itemsize, target_tile_bytes, total_bytes)
        grid = (pl.cdiv(N, tb), pl.cdiv(Lr, tl))
        in_specs = [
            pl.BlockSpec((tb, tl, 128), lambda i, j: (i, j, 0)),
            # pe: constant batch index -> resident across the batch grid axis.
            pl.BlockSpec((1, tl, 128), lambda i, j: (0, j, 0)),
        ]
        out_specs = pl.BlockSpec((tb, tl, 128), lambda i, j: (i, j, 0))
        out_shape = jax.ShapeDtypeStruct((N, Lr, 128), x.dtype)
        dims = ("parallel", "parallel")
        operands = (x.reshape(N, Lr, 128), pe_prepared)
        tile_bytes = tb * tl * 128 * itemsize
        pe_tile_bytes = tl * 128 * 4
    else:
        # Odd-C fallback: (N, L); last dim is the full extent (lane-dense row).
        assert pe_prepared.shape == (1, L)
        tb = _plan_2d(N, L, itemsize, target_tile_bytes, total_bytes)
        grid = (pl.cdiv(N, tb),)
        in_specs = [
            pl.BlockSpec((tb, L), lambda i: (i, 0)),
            pl.BlockSpec((1, L), lambda i: (0, 0)),
        ]
        out_specs = pl.BlockSpec((tb, L), lambda i: (i, 0))
        out_shape = jax.ShapeDtypeStruct((N, L), x.dtype)
        dims = ("parallel",)
        operands = (x.reshape(N, L), pe_prepared)
        tile_bytes = tb * L * itemsize
        pe_tile_bytes = L * 4

    # Double-buffered in + out tiles + pe + headroom; never below the
    # generation default so normal shapes keep their full budget.
    vmem_limit = max(vmem_limit, 4 * tile_bytes + 2 * pe_tile_bytes + (1 << 20))

    out = pl.pallas_call(
        _add_pe_kernel,
        out_shape=out_shape,
        grid=grid,
        in_specs=in_specs,
        out_specs=out_specs,
        compiler_params=pltpu.CompilerParams(
            dimension_semantics=dims,
            vmem_limit_bytes=vmem_limit,
        ),
    )(*operands)
    return out.reshape(N, C, H, W)


if __name__ == "__main__":
    # Small shapes consistent with the module: batch=2, channels=4, 8x8 board.
    N, C = 2, 4
    key = jax.random.PRNGKey(0)
    x = jax.random.normal(key, (N, C, 8, 8), dtype=jnp.float32)

    pe = make_positional_encoding(C)      # (1, C, 8, 8) f32, as in __init__
    pe_prepared = prepare_pe(pe)          # hoisted one-time flatten/cast

    out = positional_encoding_forward(x, pe_prepared)
    out = jax.block_until_ready(out)

    # Reference check (plain JAX broadcast add, f32).
    ref = x + pe
    np.testing.assert_allclose(np.asarray(out), np.asarray(ref),
                               rtol=1e-6, atol=1e-6)

    print("KERNEL_OK")
</pallas_src>

<mosaic_0001>
module attributes {stable_mosaic.version = 11 : i64} {
  func.func @_add_pe_kernel(%arg0: i32, %arg1: i32, %arg2: memref<2x2x128xf32, #tpu.memory_space<vmem>>, %arg3: memref<1x2x128xf32, #tpu.memory_space<vmem>>, %arg4: memref<2x2x128xf32, #tpu.memory_space<vmem>>) attributes {dimension_semantics = [#tpu.dimension_semantics<parallel>, #tpu.dimension_semantics<parallel>], iteration_bounds = array<i64: 1, 1>, scalar_prefetch = 0 : i64, scratch_operands = 0 : i64, tpu.core_type = #tpu.core_type<tc>, window_params = [{transform_indices = @transform_0, window_bounds = array<i64: 2, 2, 128>}, {transform_indices = @transform_1, window_bounds = array<i64: 1, 2, 128>}, {transform_indices = @transform_2, window_bounds = array<i64: 2, 2, 128>}]} {
    %c0 = arith.constant 0 : index
    %c0_0 = arith.constant 0 : index
    %c0_1 = arith.constant 0 : index
    %0 = vector.load %arg2[%c0, %c0_0, %c0_1] : memref<2x2x128xf32, #tpu.memory_space<vmem>>, vector<2x2x128xf32>
    %c0_2 = arith.constant 0 : index
    %c0_3 = arith.constant 0 : index
    %c0_4 = arith.constant 0 : index
    %1 = vector.load %arg3[%c0_2, %c0_3, %c0_4] : memref<1x2x128xf32, #tpu.memory_space<vmem>>, vector<1x2x128xf32>
    %2 = vector.broadcast %1 : vector<1x2x128xf32> to vector<2x2x128xf32>
    %3 = arith.addf %0, %2 : vector<2x2x128xf32>
    %c0_5 = arith.constant 0 : index
    %c0_6 = arith.constant 0 : index
    %c0_7 = arith.constant 0 : index
    %4 = vector.load %arg4[%c0_5, %c0_6, %c0_7] : memref<2x2x128xf32, #tpu.memory_space<vmem>>, vector<2x2x128xf32>
    tpu.vector_store %arg4[%c0_5, %c0_6, %c0_7], %3 {strides = array<i32>} : memref<2x2x128xf32, #tpu.memory_space<vmem>>, vector<2x2x128xf32>,
    return
  }
  func.func @transform_0(%arg0: i32, %arg1: i32) -> (i32, i32, i32) {
    %c0_i32 = arith.constant 0 : i32
    %c0_i32_0 = arith.constant 0 : i32
    return %arg0, %arg1, %c0_i32 : i32, i32, i32
  }
  func.func @transform_1(%arg0: i32, %arg1: i32) -> (i32, i32, i32) {
    %c0_i32 = arith.constant 0 : i32
    %c0_i32_0 = arith.constant 0 : i32
    %c0_i32_1 = arith.constant 0 : i32
    return %c0_i32, %arg1, %c0_i32_0 : i32, i32, i32
  }
  func.func @transform_2(%arg0: i32, %arg1: i32) -> (i32, i32, i32) {
    %c0_i32 = arith.constant 0 : i32
    %c0_i32_0 = arith.constant 0 : i32
    return %arg0, %arg1, %c0_i32 : i32, i32, i32
  }
}

</mosaic_0001>

<bundles_post_ra>
// kernel: tpu_custom_call.1
= control target key start
LH: loop header
LB: loop body
LE: loop exit
PB: predicated region body
PF: predicated region fallthrough
CT: control target
= control target key end

     0   :  { %7 = vsyncpa [#allocation3], 0  ;;  %s169_s0 = inlined_call_operand.hbm [shape: f32[2,2,128], index: 0, kind: input, shape index: {}]   ;;  %s170_s1 = inlined_call_operand.hbm [shape: f32[1,2,128], index: 1, kind: input, shape index: {}]   ;;  %s171_s2 = inlined_call_operand.hbm [shape: f32[2,2,128], index: 2, kind: output, shape index: {}]  }
   0x1   :  { %8 = vsyncpa [#allocation6], 0 }
   0x2   :  { %9 = vsyncpa [#allocation4], 0  ;;  %s134_s9 = smov [#allocation2]  }
   0x3   :  { %s15_s10 = sshll.u32 %s134_s9, 4  ;;  %s16_s10 = int_to_ptr.vmem [resolvable:$true] %s15_s10 }
   0x4   :  { %s76_s11 = scalar_lea.vmem %s16_s10, 64  ;;  %p81_p1 = scmp.lt.s32.totalorder %s16_s10, %s16_s10 }
   0x5   :  { %p77_p0 = scmp.ne.s32.totalorder %s16_s10, %s76_s11  ;;  %p82_p2 = scmp.lt.s32.totalorder %s76_s11, %s76_s11 }
   0x7   :  { %p83_p3 = por %p82_p2, %p81_p1 }
   0x9   :  { %p84_p4 = pnand %p83_p3, %p77_p0 }
   0xb   :  { %87 = shalt.err (!%p84_p4)
}
   0xc   :  { %s135_s12 = smov 32   ;;  %s136_s13 = smov 2  }
   0xd   :  { %21 = dma.hbm_to_vmem [thread:$0]  %s169_s0, 64, %s16_s10, [#allocation3], %s135_s12, %s135_s12, %s136_s13  }
   0xe   :  { %s137_s16 = smov [#allocation5]  }
   0xf   :  { %s28_s17 = sshll.u32 %s137_s16, 4  ;;  %s29_s17 = int_to_ptr.vmem [resolvable:$true] %s28_s17 }
  0x10   :  { %s96_s18 = scalar_lea.vmem %s29_s17, 32  ;;  %p101_p6 = scmp.lt.s32.totalorder %s29_s17, %s29_s17 }
  0x11   :  { %p97_p5 = scmp.ne.s32.totalorder %s29_s17, %s96_s18  ;;  %p102_p7 = scmp.lt.s32.totalorder %s96_s18, %s96_s18 }
  0x13   :  { %p103_p8 = por %p102_p7, %p101_p6 }
  0x15   :  { %p104_p9 = pnand %p103_p8, %p97_p5 }
  0x17   :  { %107 = shalt.err (!%p104_p9)
}
  0x18   :  { %31 = dma.hbm_to_vmem [thread:$0]  %s170_s1, 32, %s29_s17, [#allocation6]  }
  0x19   :  { %128 = dma.done.wait [#allocation3], 64  }
  0x1a   :  { %129 = vsyncadd [#allocation3], 4294967232 }
  0x1b   :  { %130 = dma.done.wait [#allocation6], 32  }
  0x1c   :  { %131 = vsyncadd [#allocation6], 4294967264  ;;  %s138_s21 = smov [#allocation7]   ;;  %v38_v0 = vld [vmem:[#allocation2] sm:$0x3] }
  0x1d   :  { %s50_s0 = sshll.u32 %s138_s21, 4  ;;  %v40_v1 = vld [vmem:[#allocation5] sm:$0x3]  ;;  %v39_v2 = vld [vmem:[#allocation2 + $0x2] sm:$0x3]  ;;  %s51_s0 = int_to_ptr.vmem [resolvable:$true] %s50_s0 }
  0x1e   :  { %v41_v3 = vadd.f32 %v40_v1, %v38_v0  ;;  %v42_v4 = vadd.f32 %v40_v1, %v39_v2  ;;  %s108_s22 = scalar_lea.vmem %s51_s0, 64  ;;  %p113_p11 = scmp.lt.s32.totalorder %s51_s0, %s51_s0 }
  0x1f   :  { %p109_p10 = scmp.ne.s32.totalorder %s51_s0, %s108_s22  ;;  %p114_p12 = scmp.lt.s32.totalorder %s108_s22, %s108_s22 }
  0x20   :  { %43 = vst [vmem:[#allocation7] sm:$0x3] %v41_v3  ;;  %44 = vst [vmem:[#allocation7 + $0x2] sm:$0x3] %v42_v4 }
  0x21   :  { %p115_p13 = por %p114_p12, %p113_p11 }
  0x23   :  { %p116_p0 = pnand %p115_p13, %p109_p10 }
  0x25   :  { %119 = shalt.err (!%p116_p0)
}
  0x26   :  { %56 = dma.vmem_to_hbm [thread:$0]  %s51_s0, 64, %s171_s2, [#allocation4], %s135_s12, %s135_s12, %s136_s13  }
  0x27   :  { %132 = dma.done.wait [#allocation4], 64  }
  0x28   :  { %133 = vsyncadd [#allocation4], 4294967232 }
  0x29   :  { %60 = vsyncpa [#allocation3], 1 }
  0x2a   :  { %61 = vsyncpa [#allocation6], 1 }
  0x2b   :  { %62 = vsyncpa [#allocation4], 1 }

</bundles_post_ra>
